<compile_context>
chip_gen: v6e
topology: v6e:2x2x1
jax: 0.10.0
libtpu: 0.0.40
codegen_flags: <defaults>
</compile_context>

<pallas_src>
import jax
import jax.numpy as jnp
from jax.experimental import pallas as pl
from jax.experimental.pallas import tpu as pltpu


def _round_up(x, m):
    return (x + m - 1) // m * m


def _make_kernel(b_actual, b_tile, chunk, K, C):
    """Kernel over one batch tile; writes [sum||I-G||_F^2, sum ce] into an (8,128) slab."""
    num_chunks = b_tile // chunk

    def kernel(target_ref, pred_ref, feat_ref, out_ref):
        tile_start = pl.program_id(0) * b_tile

        # ---- orthogonality: sum_b ||I - A_b A_b^T||_F^2 over valid rows of this tile ----
        rr = jax.lax.broadcasted_iota(jnp.int32, (K, K), 0)
        cc = jax.lax.broadcasted_iota(jnp.int32, (K, K), 1)
        eye = (rr == cc).astype(jnp.float32)                      # hoisted out of the loop

        def chunk_body(ci, acc):
            start = ci * chunk
            if chunk % 8 == 0:
                start = pl.multiple_of(start, chunk)
            a = feat_ref[pl.ds(start, chunk), :, :]               # native dtype (bf16/f32)
            # MXU: bf16/f32 operands, f32 accumulation. K is small (<=64); the tiny matmul
            # + per-batch transpose is accepted — the kernel is HBM/DMA-bound.
            gram = jnp.einsum("bij,bkj->bik", a, a,
                              preferred_element_type=jnp.float32)  # (chunk,K,K) f32
            resid = gram - eye[None, :, :]                        # diagonal minus 1
            ps = jnp.sum(resid * resid, axis=2)                   # (chunk, K)
            ps = jnp.sum(ps, axis=1, keepdims=True)               # (chunk, 1)
            local = jax.lax.broadcasted_iota(jnp.int32, (chunk, 1), 0)
            valid = (tile_start + ci * chunk + local) < b_actual
            return acc + jnp.sum(jnp.where(valid, ps, 0.0))

        resid_sq = jax.lax.fori_loop(0, num_chunks, chunk_body, jnp.float32(0.0),
                                     unroll=num_chunks <= 8)

        # ---- cross entropy, summed over valid rows of this tile ----
        pred = pred_ref[...].astype(jnp.float32)                  # f32 for exp/log (v5e)
        m = jnp.max(pred, axis=-1, keepdims=True)
        lse = jnp.log(jnp.sum(jnp.exp(pred - m), axis=-1, keepdims=True)) + m
        labels = target_ref[...] - 1                              # (b_tile, 1) 0-indexed
        cls = jax.lax.broadcasted_iota(jnp.int32, (b_tile, C), 1)
        onehot = (cls == labels).astype(jnp.float32)
        tgt = jnp.sum(onehot * pred, axis=-1, keepdims=True)      # (b_tile, 1)
        rowid = jax.lax.broadcasted_iota(jnp.int32, (b_tile, 1), 0)
        valid = (tile_start + rowid) < b_actual
        ce_sum = jnp.sum(jnp.where(valid, lse - tgt, 0.0))

        # ---- lane-dense partials slab: [0,0]=resid_sq, [0,1]=ce_sum, rest 0 ----
        sr = jax.lax.broadcasted_iota(jnp.int32, (8, 128), 0)
        sc = jax.lax.broadcasted_iota(jnp.int32, (8, 128), 1)
        slab = jnp.where((sr == 0) & (sc == 0), resid_sq,
                         jnp.where((sr == 0) & (sc == 1), ce_sum, 0.0))
        out_ref[0, :, :] = slab

    return kernel


def pointnet_loss(target, pred, feat_matrix):
    """target: (B,) int (1-indexed); pred: (B, C) logits; feat_matrix: (B, K, K).

    pred/feat are consumed in their native dtype (f32 or bf16); only the small pred tile
    is cast to f32 inside the kernel (softmax path), feat goes to the MXU untouched.
    """
    B, C = pred.shape
    K = feat_matrix.shape[1]
    feat_itemsize = feat_matrix.dtype.itemsize
    pred_itemsize = pred.dtype.itemsize

    # --- batch tile: ~1 MiB of feat per block; multiple of 8 when actually tiling ---
    b_tile = max(1, (1 << 20) // (K * K * feat_itemsize))
    if b_tile >= B:
        b_tile = B                                    # single tile: block == full array
    else:
        b_tile = max(8, (b_tile // 8) * 8)
    b_pad = int(pl.cdiv(B, b_tile)) * b_tile
    num_tiles = b_pad // b_tile

    # --- inner chunk: keep the f32 gram chunk <= ~128 KiB (no VMEM spill pass) ---
    chunk = min(b_tile, max(1, (128 * 1024) // (K * K * 4)))
    while b_tile % chunk:
        chunk -= 1

    # --- pad batch to the tile multiple (padded rows are masked inside the kernel) ---
    if b_pad != B:
        target = jnp.pad(target, (0, b_pad - B), constant_values=1)
        pred = jnp.pad(pred, ((0, b_pad - B), (0, 0)))
        feat_matrix = jnp.pad(feat_matrix, ((0, b_pad - B), (0, 0), (0, 0)))
    target2d = target.reshape(b_pad, 1).astype(jnp.int32)

    # --- cost estimate from padded (8,128)-tile footprints, not raw element counts ---
    feat_blk = b_tile * _round_up(K, 8) * _round_up(K, 128) * feat_itemsize
    pred_blk = _round_up(b_tile, 8) * _round_up(C, 128) * pred_itemsize
    tgt_blk = _round_up(b_tile, 8) * 128 * 4
    out_blk = 8 * 128 * 4
    cost = pl.CostEstimate(
        flops=int(2 * B * K**3 + 3 * B * K * K + 8 * B * C),
        transcendentals=int(B * C + B),
        bytes_accessed=int(num_tiles * (feat_blk + pred_blk + tgt_blk + out_blk)),
    )

    # --- VMEM: double-buffered blocks + gram chunk + headroom, capped for v7x (64 MiB/TC) ---
    vmem_limit = int(min(max(2 * (feat_blk + pred_blk + tgt_blk + out_blk)
                             + 2 * chunk * K * K * 4 + (4 << 20), 16 << 20), 48 << 20))

    kernel = _make_kernel(B, b_tile, chunk, K, C)
    partials = pl.pallas_call(
        kernel,
        out_shape=jax.ShapeDtypeStruct((num_tiles, 8, 128), jnp.float32),
        grid_spec=pltpu.PrefetchScalarGridSpec(
            num_scalar_prefetch=0,
            grid=(num_tiles,),
            in_specs=[
                pl.BlockSpec((b_tile, 1), lambda i: (i, 0)),        # target (int32)
                pl.BlockSpec((b_tile, C), lambda i: (i, 0)),        # pred   (native dtype)
                pl.BlockSpec((b_tile, K, K), lambda i: (i, 0, 0)),  # feat   (native dtype)
            ],
            out_specs=pl.BlockSpec((1, 8, 128), lambda i: (i, 0, 0)),
        ),
        compiler_params=pltpu.CompilerParams(
            dimension_semantics=("parallel",),        # independent tiles: megacore-friendly
            vmem_limit_bytes=vmem_limit,
        ),
        cost_estimate=cost,
    )(target2d, pred, feat_matrix)

    # Tiny final combine in XLA (per-tile partials -> scalar loss).
    resid_sq_total = jnp.sum(partials[:, 0, 0])
    ce_total = jnp.sum(partials[:, 0, 1])
    return ce_total / jnp.float32(B) + jnp.float32(0.001) * jnp.sqrt(resid_sq_total)


def pointnet_loss_ref(target, pred, feat_matrix):
    """Pure-JAX reference mirroring the PyTorch forward exactly."""
    K = feat_matrix.shape[1]
    gram = jnp.einsum("bij,bkj->bik", feat_matrix, feat_matrix)
    orth = jnp.linalg.norm(jnp.eye(K, dtype=jnp.float32)[None] - gram)
    labels = target - 1
    logp = jax.nn.log_softmax(pred, axis=-1)
    ce = -jnp.mean(jnp.take_along_axis(logp, labels[:, None], axis=-1))
    return ce + 0.001 * orth


if __name__ == "__main__":
    key = jax.random.PRNGKey(0)
    k1, k2, k3 = jax.random.split(key, 3)

    B, C, K = 2, 8, 16                       # batch, num classes, feat-transform dim
    pred = jax.random.normal(k1, (B, C), dtype=jnp.float32)
    feat_matrix = jax.random.normal(k2, (B, K, K), dtype=jnp.float32) * 0.1
    target = jax.random.randint(k3, (B,), 1, C + 1, dtype=jnp.int32)  # 1-indexed labels

    # f32 path
    loss = jax.block_until_ready(pointnet_loss(target, pred, feat_matrix))
    ref = pointnet_loss_ref(target, pred, feat_matrix)
    assert jnp.allclose(loss, ref, rtol=1e-4, atol=1e-4), (loss, ref)

    # bf16 path: native bf16 feat/pred flow straight into the kernel (MXU bf16 operands,
    # f32 accumulation); compare against the reference on the same bf16-rounded values.
    pred_bf = pred.astype(jnp.bfloat16)
    feat_bf = feat_matrix.astype(jnp.bfloat16)
    loss_bf = jax.block_until_ready(pointnet_loss(target, pred_bf, feat_bf))
    ref_bf = pointnet_loss_ref(
        target, pred_bf.astype(jnp.float32), feat_bf.astype(jnp.float32)
    )
    assert jnp.allclose(loss_bf, ref_bf, rtol=2e-3, atol=2e-3), (loss_bf, ref_bf)

    print("KERNEL_OK")
</pallas_src>

<mosaic_0001>
module attributes {stable_mosaic.version = 11 : i64} {
  func.func @kernel(%arg0: i32, %arg1: memref<2x1xi32, #tpu.memory_space<vmem>>, %arg2: memref<2x8xf32, #tpu.memory_space<vmem>>, %arg3: memref<2x16x16xf32, #tpu.memory_space<vmem>>, %arg4: memref<1x8x128xf32, #tpu.memory_space<vmem>>) attributes {dimension_semantics = [#tpu.dimension_semantics<parallel>], iteration_bounds = array<i64: 1>, scalar_prefetch = 0 : i64, scratch_operands = 0 : i64, tpu.core_type = #tpu.core_type<tc>, window_params = [{transform_indices = @transform_0, window_bounds = array<i64: 2, 1>}, {transform_indices = @transform_1, window_bounds = array<i64: 2, 8>}, {transform_indices = @transform_2, window_bounds = array<i64: 2, 16, 16>}, {transform_indices = @transform_3, window_bounds = array<i64: 1, 8, 128>}]} {
    %c2_i32 = arith.constant 2 : i32
    %0 = arith.muli %arg0, %c2_i32 : i32
    %1 = tpu.iota {dimensions = array<i32: 0>} : vector<16x16xi32>
    %2 = tpu.iota {dimensions = array<i32: 1>} : vector<16x16xi32>
    %3 = arith.cmpi eq, %1, %2 : vector<16x16xi32>
    %4 = arith.extui %3 : vector<16x16xi1> to vector<16x16xi32>
    %5 = arith.sitofp %4 : vector<16x16xi32> to vector<16x16xf32>
    %cst = arith.constant 0.000000e+00 : f32
    %c0_i32 = arith.constant 0 : i32
    %c2_i32_0 = arith.constant 2 : i32
    %6 = arith.muli %c0_i32, %c2_i32_0 : i32
    %7 = arith.index_cast %6 : i32 to index
    %c0 = arith.constant 0 : index
    %c0_1 = arith.constant 0 : index
    %8 = vector.load %arg3[%7, %c0, %c0_1] : memref<2x16x16xf32, #tpu.memory_space<vmem>>, vector<2x16x16xf32>
    "tpu.trace_start"() <{level = 10 : i32, message = "bij,bkj->bik"}> : () -> ()
    %cst_2 = arith.constant dense<0.000000e+00> : vector<2x16x16xf32>
    %9 = tpu.matmul %8, %8, %cst_2 {dimension_numbers = #tpu.dot_dimension_numbers<[2], [2], [1], [1], [0, 0, 0, 1, 1, 1], [0], [0]>} : vector<2x16x16xf32>, vector<2x16x16xf32>, vector<2x16x16xf32> -> vector<2x16x16xf32>
    "tpu.trace_stop"() : () -> ()
    %10 = vector.shape_cast %5 : vector<16x16xf32> to vector<1x16x16xf32>
    %11 = vector.broadcast %10 : vector<1x16x16xf32> to vector<2x16x16xf32>
    %12 = arith.subf %9, %11 : vector<2x16x16xf32>
    %13 = arith.mulf %12, %12 : vector<2x16x16xf32>
    %cst_3 = arith.constant dense<0.000000e+00> : vector<2x16xf32>
    %14 = vector.multi_reduction <add>, %13, %cst_3 [2] : vector<2x16x16xf32> to vector<2x16xf32>
    %cst_4 = arith.constant dense<0.000000e+00> : vector<2xf32>
    %15 = vector.multi_reduction <add>, %14, %cst_4 [1] : vector<2x16xf32> to vector<2xf32>
    %16 = vector.shape_cast %15 : vector<2xf32> to vector<2x1xf32>
    %17 = tpu.iota {dimensions = array<i32: 0>} : vector<2x1xi32>
    %c2_i32_5 = arith.constant 2 : i32
    %18 = arith.muli %c0_i32, %c2_i32_5 : i32
    %19 = arith.addi %0, %18 : i32
    %20 = vector.broadcast %19 : i32 to vector<2x1xi32>
    %21 = arith.addi %20, %17 : vector<2x1xi32>
    %c2_i32_6 = arith.constant 2 : i32
    %22 = vector.broadcast %c2_i32_6 : i32 to vector<2x1xi32>
    %23 = arith.cmpi slt, %21, %22 : vector<2x1xi32>
    %cst_7 = arith.constant 0.000000e+00 : f32
    %24 = vector.broadcast %cst_7 : f32 to vector<2x1xf32>
    %25 = arith.select %23, %16, %24 : vector<2x1xi1>, vector<2x1xf32>
    %26 = vector.shape_cast %25 : vector<2x1xf32> to vector<1x2x1xf32>
    %cst_8 = arith.constant dense<0.000000e+00> : vector<1xf32>
    %27 = vector.multi_reduction <add>, %26, %cst_8 [1, 2] : vector<1x2x1xf32> to vector<1xf32>
    %28 = vector.shape_cast %27 : vector<1xf32> to vector<1x1x1xf32>
    %29 = vector.extract %28[0, 0, 0] : f32 from vector<1x1x1xf32>
    %30 = arith.addf %cst, %29 : f32
    %c1_i32 = arith.constant 1 : i32
    %c0_9 = arith.constant 0 : index
    %c0_10 = arith.constant 0 : index
    %31 = vector.load %arg2[%c0_9, %c0_10] : memref<2x8xf32, #tpu.memory_space<vmem>>, vector<2x8xf32>
    %cst_11 = arith.constant dense<0xFF800000> : vector<2xf32>
    %32 = vector.multi_reduction <maximumf>, %31, %cst_11 [1] : vector<2x8xf32> to vector<2xf32>
    %33 = vector.shape_cast %32 : vector<2xf32> to vector<2x1xf32>
    %34 = vector.broadcast %33 : vector<2x1xf32> to vector<2x8xf32>
    %35 = arith.subf %31, %34 : vector<2x8xf32>
    %36 = math.exp %35 : vector<2x8xf32>
    %cst_12 = arith.constant dense<0.000000e+00> : vector<2xf32>
    %37 = vector.multi_reduction <add>, %36, %cst_12 [1] : vector<2x8xf32> to vector<2xf32>
    %38 = vector.shape_cast %37 : vector<2xf32> to vector<2x1xf32>
    %39 = math.log %38 : vector<2x1xf32>
    %40 = arith.addf %39, %33 : vector<2x1xf32>
    %c0_13 = arith.constant 0 : index
    %c0_14 = arith.constant 0 : index
    %41 = vector.load %arg1[%c0_13, %c0_14] : memref<2x1xi32, #tpu.memory_space<vmem>>, vector<2x1xi32>
    %c1_i32_15 = arith.constant 1 : i32
    %42 = vector.broadcast %c1_i32_15 : i32 to vector<2x1xi32>
    %43 = arith.subi %41, %42 : vector<2x1xi32>
    %44 = tpu.iota {dimensions = array<i32: 1>} : vector<2x8xi32>
    %45 = vector.broadcast %43 : vector<2x1xi32> to vector<2x8xi32>
    %46 = arith.cmpi eq, %44, %45 : vector<2x8xi32>
    %47 = arith.extui %46 : vector<2x8xi1> to vector<2x8xi32>
    %48 = arith.sitofp %47 : vector<2x8xi32> to vector<2x8xf32>
    %49 = arith.mulf %48, %31 : vector<2x8xf32>
    %cst_16 = arith.constant dense<0.000000e+00> : vector<2xf32>
    %50 = vector.multi_reduction <add>, %49, %cst_16 [1] : vector<2x8xf32> to vector<2xf32>
    %51 = vector.shape_cast %50 : vector<2xf32> to vector<2x1xf32>
    %52 = tpu.iota {dimensions = array<i32: 0>} : vector<2x1xi32>
    %53 = vector.broadcast %0 : i32 to vector<2x1xi32>
    %54 = arith.addi %53, %52 : vector<2x1xi32>
    %c2_i32_17 = arith.constant 2 : i32
    %55 = vector.broadcast %c2_i32_17 : i32 to vector<2x1xi32>
    %56 = arith.cmpi slt, %54, %55 : vector<2x1xi32>
    %57 = arith.subf %40, %51 : vector<2x1xf32>
    %cst_18 = arith.constant 0.000000e+00 : f32
    %58 = vector.broadcast %cst_18 : f32 to vector<2x1xf32>
    %59 = arith.select %56, %57, %58 : vector<2x1xi1>, vector<2x1xf32>
    %60 = vector.shape_cast %59 : vector<2x1xf32> to vector<1x2x1xf32>
    %cst_19 = arith.constant dense<0.000000e+00> : vector<1xf32>
    %61 = vector.multi_reduction <add>, %60, %cst_19 [1, 2] : vector<1x2x1xf32> to vector<1xf32>
    %62 = vector.shape_cast %61 : vector<1xf32> to vector<1x1x1xf32>
    %63 = vector.extract %62[0, 0, 0] : f32 from vector<1x1x1xf32>
    %64 = tpu.iota {dimensions = array<i32: 0>} : vector<8x128xi32>
    %65 = tpu.iota {dimensions = array<i32: 1>} : vector<8x128xi32>
    %c0_i32_20 = arith.constant 0 : i32
    %66 = vector.broadcast %c0_i32_20 : i32 to vector<8x128xi32>
    %67 = arith.cmpi eq, %64, %66 : vector<8x128xi32>
    %c0_i32_21 = arith.constant 0 : i32
    %68 = vector.broadcast %c0_i32_21 : i32 to vector<8x128xi32>
    %69 = arith.cmpi eq, %65, %68 : vector<8x128xi32>
    %70 = arith.andi %67, %69 : vector<8x128xi1>
    %c0_i32_22 = arith.constant 0 : i32
    %71 = vector.broadcast %c0_i32_22 : i32 to vector<8x128xi32>
    %72 = arith.cmpi eq, %64, %71 : vector<8x128xi32>
    %c1_i32_23 = arith.constant 1 : i32
    %73 = vector.broadcast %c1_i32_23 : i32 to vector<8x128xi32>
    %74 = arith.cmpi eq, %65, %73 : vector<8x128xi32>
    %75 = arith.andi %72, %74 : vector<8x128xi1>
    %cst_24 = arith.constant 0.000000e+00 : f32
    %76 = vector.broadcast %63 : f32 to vector<8x128xf32>
    %77 = vector.broadcast %cst_24 : f32 to vector<8x128xf32>
    %78 = arith.select %75, %76, %77 : vector<8x128xi1>, vector<8x128xf32>
    %79 = vector.broadcast %30 : f32 to vector<8x128xf32>
    %80 = arith.select %70, %79, %78 : vector<8x128xi1>, vector<8x128xf32>
    %c0_25 = arith.constant 0 : index
    %c0_26 = arith.constant 0 : index
    %c0_27 = arith.constant 0 : index
    %81 = vector.load %arg4[%c0_25, %c0_26, %c0_27] : memref<1x8x128xf32, #tpu.memory_space<vmem>>, vector<1x8x128xf32>
    %82 = vector.shape_cast %81 : vector<1x8x128xf32> to vector<8x128xf32>
    %83 = vector.shape_cast %80 : vector<8x128xf32> to vector<1x8x128xf32>
    tpu.vector_store %arg4[%c0_25, %c0_26, %c0_27], %83 {strides = array<i32>} : memref<1x8x128xf32, #tpu.memory_space<vmem>>, vector<1x8x128xf32>,
    return
  }
  func.func @transform_0(%arg0: i32) -> (i32, i32) {
    %c0_i32 = arith.constant 0 : i32
    %c0_i32_0 = arith.constant 0 : i32
    return %arg0, %c0_i32 : i32, i32
  }
  func.func @transform_1(%arg0: i32) -> (i32, i32) {
    %c0_i32 = arith.constant 0 : i32
    %c0_i32_0 = arith.constant 0 : i32
    return %arg0, %c0_i32 : i32, i32
  }
  func.func @transform_2(%arg0: i32) -> (i32, i32, i32) {
    %c0_i32 = arith.constant 0 : i32
    %c0_i32_0 = arith.constant 0 : i32
    %c0_i32_1 = arith.constant 0 : i32
    return %arg0, %c0_i32, %c0_i32_0 : i32, i32, i32
  }
  func.func @transform_3(%arg0: i32) -> (i32, i32, i32) {
    %c0_i32 = arith.constant 0 : i32
    %c0_i32_0 = arith.constant 0 : i32
    %c0_i32_1 = arith.constant 0 : i32
    return %arg0, %c0_i32, %c0_i32_0 : i32, i32, i32
  }
}

</mosaic_0001>

<bundles_post_ra>
// kernel: tpu_custom_call.1
= control target key start
LH: loop header
LB: loop body
LE: loop exit
PB: predicated region body
PF: predicated region fallthrough
CT: control target
= control target key end

     0   :  { %8 = vsyncpa [#allocation3], 0  ;;  %s515_s0 = inlined_call_operand.vmem [shape: s32[2,1], index: 0, kind: input, shape index: {}]   ;;  %s516_s1 = inlined_call_operand.vmem [shape: f32[2,8], index: 1, kind: input, shape index: {}]   ;;  %s517_s2 = inlined_call_operand.hbm [shape: f32[2,16,16], index: 2, kind: input, shape index: {}]   ;;  %s518_s3 = inlined_call_operand.hbm [shape: f32[1,8,128], index: 3, kind: output, shape index: {}]  }
   0x1   :  { %9 = vsyncpa [#allocation4], 0  ;;  %s432_s12 = smov [#allocation2]  }
   0x2   :  { %s19_s13 = sshll.u32 %s432_s12, 4  ;;  %s20_s13 = int_to_ptr.vmem [resolvable:$true] %s19_s13 }
   0x3   :  { %s396_s14 = scalar_lea.vmem %s20_s13, 512  ;;  %p401_p1 = scmp.lt.s32.totalorder %s20_s13, %s20_s13 }
   0x4   :  { %p397_p0 = scmp.ne.s32.totalorder %s20_s13, %s396_s14  ;;  %p402_p2 = scmp.lt.s32.totalorder %s396_s14, %s396_s14 }
   0x6   :  { %p403_p3 = por %p402_p2, %p401_p1 }
   0x8   :  { %p404_p4 = pnand %p403_p3, %p397_p0 }
   0xa   :  { %407 = shalt.err (!%p404_p4)
}
   0xb   :  { %s433_s15 = smov 128   ;;  %s434_s16 = smov 8  }
   0xc   :  { %25 = dma.hbm_to_vmem [thread:$0]  %s517_s2, 512, %s20_s13, [#allocation3], %s433_s15, %s433_s15, %s434_s16  }
   0xd   :  { %428 = dma.done.wait [#allocation3], 512  }
   0xe   :  { %429 = vsyncadd [#allocation3], 4294966784  ;;  %vm45_vm0 = vcmask 130048   ;;  %vm276_vm1 = vcmask 58368   ;;  %v42_v0 = vld [vmem:[#allocation2 + $0x8] sm:$0xff]  ;;  %v44_v1 = vld [vmem:[#allocation2 + $0x18] sm:$0xff]  ;;  %v30_v7 = vlaneseq }
   0xf   :  { %v41_v2 = vld [vmem:[#allocation2] sm:$0xff]  ;;  %358 = vmatprep.subr.msk.mxu0 %vm45_vm0, %v42_v0  ;;  %365 = vmatprep.subr.msk.mxu1 %vm45_vm0, %v44_v1  ;;  %v43_v3 = vld [vmem:[#allocation2 + $0x10] sm:$0xff]  ;;  %v435_v6 = vmov 0   ;;  %v436_v14 = vmov 0.0   ;;  %vm241_vm5 = vcmask 130112   ;;  %vm252_vm6 = vcmask 1041409  }
  0x10   :  { %v466_v4 = vld [vmem:[%s516_s1] sm:$0x3]  ;;  %359 = vmatpush3.xpose.msk.msra.mxu0 %vm45_vm0, %v42_v0  ;;  %366 = vmatpush3.xpose.msk.msra.mxu1 %vm45_vm0, %v44_v1  ;;  %v482_v9 = vshrl.u32 %v30_v7, 7  ;;  %v487_v12 = vand.u32 127, %v30_v7  ;;  %vm255_vm7 = vcmask 123904   ;;  %vm263_vm9 = vcmask 1024  }
  0x11   :  { %v277_v5 = vsel %vm276_vm1, %v466_v4, -inf  ;;  %360 = vmatprep.subr.msk.mxu0 %vm45_vm0, %v41_v2  ;;  %367 = vmatprep.subr.msk.mxu1 %vm45_vm0, %v43_v3  ;;  %v289_v35 = vld [vmem:[%s515_s0] sm:$0x3]  ;;  %s437_s21 = smov [#allocation5]  }
  0x12   :  { %362 = vmatprep.mubr.msk.f32.mxu0 %vm45_vm0, %v41_v2  ;;  %369 = vmatprep.mubr.msk.f32.mxu1 %vm45_vm0, %v43_v3  ;;  %v32_v11 = vadd.s32 8, %v482_v9  ;;  %vm35_vm3 = vcmp.eq.s32.totalorder %v482_v9, %v487_v12  ;;  %v348_v36 = vadd.s32 4294967295, %v289_v35  ;;  %v236_v38 = vadd.s32 4294967288, %v487_v12  ;;  %s329_s22 = sshll.u32 %s437_s21, 4  ;;  %s330_s22 = int_to_ptr.vmem [resolvable:$true] %s329_s22 }
  0x13   :  { %278 = vmax.xlane.f32.xlu0 %v277_v5  ;;  %382 = vset.pattern.permute.xlu1 %v435_v6  ;;  %v338_v18 = vsel %vm35_vm3, 1.0, %v436_v14  ;;  %v234_v42 = vsub.s32 %v487_v12, %v482_v9  ;;  %vm261_vm8 = vcmp.lt.s32.totalorder %v482_v9, 2  ;;  %vm313_vm10 = vcmp.eq.s32.totalorder %v482_v9, 0  ;;  %s408_s24 = scalar_lea.vmem %s330_s22, 128  ;;  %p413_p6 = scmp.lt.s32.totalorder %s330_s22, %s330_s22 }
  0x14   :  { %361 = vmatpush3.xpose.msk.msra.mxu0 %vm45_vm0, %v41_v2  ;;  %368 = vmatpush3.xpose.msk.msra.mxu1 %vm45_vm0, %v43_v3  ;;  %vm36_vm2 = vcmp.eq.s32.totalorder %v32_v11, %v487_v12  ;;  %v239_v41 = vsub.s32 %v236_v38, %v482_v9  ;;  %vm316_vm11 = vcmp.eq.s32.totalorder %v487_v12, 1  ;;  %vm314_vm12 = vcmp.eq.s32.totalorder %v487_v12, 0  ;;  %p409_p5 = scmp.ne.s32.totalorder %s330_s22, %s408_s24  ;;  %p414_p7 = scmp.lt.s32.totalorder %s408_s24, %s408_s24 }
  0x15   :  { %383 = vset.pattern.permute.xlu0 %v435_v6  ;;  %v339_v15 = vsel %vm36_vm2, 1.0, %v436_v14  ;;  %vm317_vm13 = vmand %vm313_vm10, %vm316_vm11 }
  0x16   :  { %vm315_vm14 = vmand %vm313_vm10, %vm314_vm12  ;;  %p415_p8 = por %p414_p7, %p413_p6 }
  0x17   :  { %363 = vmatmul.mubr.msk.f32.vlgmr.msra.gmra.mxu0 %vm45_vm0, %v42_v0  ;;  %370 = vmatmul.mubr.msk.f32.vlgmr.msra.gmra.mxu1 %vm45_vm0, %v44_v1 }
  0x18   :  { %p416_p9 = pnand %p415_p8, %p409_p5 }
  0x9c   :  { %v480_v8 = vpop.xlane.xlu0 %278 }
  0x9d   :  { %v280_v10 = vsub.f32 %v466_v4, %v480_v8 }
  0x9f   :  { %v281_v13 = vmul.f32 1.442695, %v280_v10 }
  0xa1   :  { %384 = vpow2.f32 %v281_v13 }
  0xae   :  { %v385_v32 = vpop.eup %384 }
  0xaf   :  { %v283_v34 = vsel %vm276_vm1, %v385_v32, 0.0 }
  0xd7   :  { %v364_v16 = vpop.f32.mrf.mxu0  ;;  %v371_v17 = vpop.f32.mrf.mxu1 }
  0xd8   :  { %v209_v19 = vsub.f32 %v364_v16, %v339_v15  ;;  %v211_v23 = vsub.f32 %v371_v17, %v339_v15 }
  0xd9   :  { %v118_v20 = vpop.f32.mrf.mxu0  ;;  %v199_v21 = vpop.f32.mrf.mxu1 }
  0xda   :  { %v213_v22 = vmul.f32 %v209_v19, %v209_v19  ;;  %v208_v24 = vsub.f32 %v118_v20, %v338_v18  ;;  %v210_v25 = vsub.f32 %v199_v21, %v338_v18  ;;  %v215_v29 = vmul.f32 %v211_v23, %v211_v23 }
  0xdc   :  { %v212_v26 = vmul.f32 %v208_v24, %v208_v24  ;;  %v214_v27 = vmul.f32 %v210_v25, %v210_v25  ;;  %v219_v28 = vsel %vm45_vm0, %v213_v22, 0.0  ;;  %v225_v33 = vsel %vm45_vm0, %v215_v29, 0.0 }
  0xdd   :  { %220 = vadd.xlane.f32.xlu1 %v219_v28 }
  0xde   :  { %v216_v30 = vsel %vm45_vm0, %v212_v26, 0.0  ;;  %v222_v31 = vsel %vm45_vm0, %v214_v27, 0.0 }
  0xdf   :  { %217 = vadd.xlane.f32.xlu0 %v216_v30 }
  0xe1   :  { %223 = vadd.xlane.f32.xlu1 %v222_v31 }
  0xe3   :  { %226 = vadd.xlane.f32.xlu0 %v225_v33 }
  0xe7   :  { %284 = vadd.xlane.f32.xlu0 %v283_v34 }
  0xf2   :  { %292 = vperm.xlu1 %382, %v348_v36  }
 0x166   :  { %v221_v37 = vpop.xlane.xlu1 %220 }
 0x167   :  { %v240_v49 = vrot.slane %v221_v37, %v239_v41 }
 0x168   :  { %v218_v39 = vpop.xlane.xlu0 %217 }
 0x169   :  { %v235_v46 = vrot.slane %v218_v39, %v234_v42 }
 0x16a   :  { %v224_v40 = vpop.xlane.xlu1 %223 }
 0x16b   :  { %v246_v47 = vrot.slane %v224_v40, %v234_v42  ;;  %v242_v53 = vsel %vm241_vm5, %v240_v49, %v235_v46 }
 0x16c   :  { %v227_v43 = vpop.xlane.xlu0 %226 }
 0x16d   :  { %v250_v44 = vrot.slane %v227_v43, %v239_v41 }
 0x16e   :  { %v293_v45 = vpop.permute.xlu1 %292 }
 0x16f   :  { %vm294_vm4 = vcmp.eq.s32.totalorder %v487_v12, %v293_v45  ;;  %v251_v51 = vsel %vm241_vm5, %v250_v44, %v246_v47 }
 0x170   :  { %v349_v48 = vsel %vm294_vm4, 1.0, %v436_v14  ;;  %v253_v54 = vsel %vm252_vm6, %v251_v51, %v242_v53  ;;  %v285_v56 = vpop.xlane.xlu0 %284 }
 0x171   :  { %v297_v50 = vmul.f32 %v349_v48, %v466_v4  ;;  %v256_v55 = vsel %vm255_vm7, %v253_v54, 0.0  ;;  %386 = vlog2.f32 %v285_v56 }
 0x173   :  { %v298_v52 = vsel %vm276_vm1, %v297_v50, 0.0 }
 0x174   :  { %299 = vadd.xlane.f32.xlu0 %v298_v52 }
 0x178   :  { %257 = vadd.xlane.f32.xlu0 %v256_v55 }
 0x17e   :  { %v387_v57 = vpop.eup %386 }
 0x17f   :  { %v287_v58 = vmul.f32 0.6931472, %v387_v57 }
 0x181   :  { %v288_v59 = vadd.f32 %v287_v58, %v480_v8 }
 0x1fd   :  { %v300_v60 = vpop.xlane.xlu0 %299 }
 0x1fe   :  { %v301_v61 = vsub.f32 %v288_v59, %v300_v60 }
 0x200   :  { %v302_v62 = vsel %vm261_vm8, %v301_v61, 0.0 }
 0x201   :  { %v258_v63 = vpop.xlane.xlu0 %257  ;;  %v303_v0 = vsel %vm263_vm9, %v302_v62, 0.0 }
 0x202   :  { %v262_v1 = vsel %vm261_vm8, %v258_v63, 0.0  ;;  %304 = vadd.xlane.f32.xlu1 %v303_v0 }
 0x203   :  { %v264_v2 = vsel %vm263_vm9, %v262_v1, 0.0 }
 0x204   :  { %265 = vadd.xlane.f32.xlu0 %v264_v2 }
 0x28b   :  { %v305_v3 = vpop.xlane.xlu1 %304 }
 0x28c   :  { %v306_v4 = vrot.slane %v305_v3, 4 }
 0x28d   :  { %v266_v5 = vpop.xlane.xlu0 %265 }
 0x28e   :  { %v307_v6 = vadd.f32 %v306_v4, %v305_v3  ;;  %v267_v7 = vrot.slane %v266_v5, 4 }
 0x290   :  { %v308_v10 = vrot.slane %v307_v6, 2  ;;  %v268_v11 = vadd.f32 %v267_v7, %v266_v5 }
 0x292   :  { %v309_v8 = vadd.f32 %v308_v10, %v307_v6  ;;  %v269_v13 = vrot.slane %v268_v11, 2 }
 0x294   :  { %v270_v14 = vadd.f32 %v269_v13, %v268_v11  ;;  %v310_v15 = vrot.slane %v309_v8, 1 }
 0x296   :  { %v271_v16 = vrot.slane %v270_v14, 1  ;;  %v311_v18 = vadd.f32 %v310_v15, %v309_v8 }
 0x298   :  { %v272_v17 = vadd.f32 %v271_v16, %v270_v14 }
 0x29a   :  { %372 = vpush %v272_v17 }
 0x29b   :  { %374 = vpush %v311_v18 }
 0x2cb   :  { %s373_s0 = spop %372 }
 0x2cc   :  { %v320_v19 = vstv %s373_s0  ;;  %s375_s23 = spop %374 }
 0x2cd   :  { %v318_v20 = vstv %s375_s23 }
 0x2ce   :  { %v319_v21 = vsel %vm317_vm13, %v318_v20, 0.0 }
 0x2cf   :  { %v321_v22 = vsel %vm315_vm14, %v320_v19, %v319_v21 }
 0x2d0   :  { %322 = vst [vmem:[#allocation5] sm:$0xff] %v321_v22 }
 0x2d1   :  { %419 = shalt.err (!%p416_p9)
}
 0x2d2   :  { %332 = dma.vmem_to_hbm [thread:$0]  %s330_s22, 128, %s518_s3, [#allocation4]  }
 0x2d3   :  { %430 = dma.done.wait [#allocation4], 128  }
 0x2d4   :  { %431 = vsyncadd [#allocation4], 4294967168 }
 0x2d5   :  { %336 = vsyncpa [#allocation3], 1 }
 0x2d6   :  { %337 = vsyncpa [#allocation4], 1 }

</bundles_post_ra>
